<compile_context>
chip_gen: v7x
topology: tpu7x:2x2x1
jax: 0.10.0
libtpu: 0.0.40
codegen_flags: <defaults>
</compile_context>

<pallas_src>
import functools

import jax
import jax.numpy as jnp
from jax import lax
from jax.experimental import pallas as pl
from jax.experimental.pallas import tpu as pltpu


def make_pe(embedding_size: int, max_length: int = 5000) -> jnp.ndarray:
    """Exactly mirrors PositionalEncoding.get_pe() (note the `/ 300`, not `/ d_model`)."""
    position = jnp.arange(0, max_length, dtype=jnp.float32).reshape(-1, 1)        # (L, 1)
    div = jnp.power(10000.0,
                    jnp.arange(0, embedding_size, 2, dtype=jnp.float32) / 300.0)  # (D/2,)
    angles = position / div                                                        # (L, D/2)
    pe = jnp.zeros((max_length, embedding_size), dtype=jnp.float32)
    pe = pe.at[:, 0::2].set(jnp.sin(angles))
    pe = pe.at[:, 1::2].set(jnp.cos(angles))
    return pe[None]                                                                # (1, L, D)


def _pe_dropout_kernel(seed_ref, x_ref, pe_ref, o_ref, *,
                       dropout_p, training, total_rows):
    # x_ref: (1, TR, C) block of one batch element; pe_ref: (TR, C) shared table tile.
    y = x_ref[0] + pe_ref[...]                                    # broadcast add, f32

    if training and dropout_p > 0.0:
        keep_p = 1.0 - float(dropout_p)
        r = pl.program_id(0)            # row-tile index
        b = pl.program_id(1)            # batch index (innermost grid axis)
        tr, c = pe_ref.shape

        # Global flat element index -> independent dropout stream per element,
        # per batch element and per row tile (counter-based, no stateful PRNG).
        row0 = (b * total_rows + r * tr).astype(jnp.uint32)
        rows = lax.broadcasted_iota(jnp.uint32, (tr, c), 0)
        lanes = lax.broadcasted_iota(jnp.uint32, (tr, c), 1)
        idx = (row0 + rows) * jnp.uint32(c) + lanes

        # lowbias32-style integer mix of (index, seed) -> uniform uint32 bits.
        h = idx ^ (seed_ref[0].astype(jnp.uint32) * jnp.uint32(0x9E3779B9))
        h = h ^ (h >> jnp.uint32(16))
        h = h * jnp.uint32(0x7FEB352D)
        h = h ^ (h >> jnp.uint32(15))
        h = h * jnp.uint32(0x846CA68B)
        h = h ^ (h >> jnp.uint32(16))

        # Integer-domain keep decision: keep iff bits < keep_p * 2^32 (exact to 2^-32).
        thresh = jnp.uint32(min(int(keep_p * 4294967296.0), 4294967295))
        keep = h < thresh
        # Inverted dropout, matching nn.Dropout(p) in training mode.
        y = jnp.where(keep, y * (1.0 / keep_p), jnp.zeros_like(y))

    o_ref[0] = y.astype(o_ref.dtype)


def positional_encoding_forward(x, pe, *, dropout_p=0.1, training=False, seed=0):
    """x: [B, S, D] float32; pe: [1, max_length, D]. Returns [B, S, D]."""
    B, S, D = x.shape
    pe_s = pe[0, :S, :]                                  # glue: slice pe[:, :S, :]

    # Lane-dense view: fold (S, D) into rows of 128 lanes when possible.  The op is
    # purely elementwise (pe broadcasts only over batch), so this is layout plumbing.
    F = S * D
    if F % 128 == 0:
        R, C = F // 128, 128
    else:
        R, C = S, D          # fallback: keep D as the lane dim (full-extent block)
    xv = x.reshape(B, R, C)
    pev = pe_s.reshape(R, C)

    # Row tile: ~1 MiB f32 x-tile, rows a multiple of 8 (or the full extent).
    # 2x x-tile + 2x out-tile + 2x pe-tile ~= 6 MiB -> fits the default scoped-VMEM
    # limit and v7x's 64 MiB physical VMEM with large headroom.
    target_rows = max(8, (((1 << 20) // (C * 4)) // 8) * 8)
    TR = R if R <= target_rows else target_rows
    num_r_tiles = (R + TR - 1) // TR

    kernel = functools.partial(_pe_dropout_kernel,
                               dropout_p=float(dropout_p),
                               training=bool(training),
                               total_rows=R)
    seed_arr = jnp.asarray([seed], dtype=jnp.int32)

    out = pl.pallas_call(
        kernel,
        out_shape=jax.ShapeDtypeStruct((B, R, C), x.dtype),
        grid_spec=pltpu.PrefetchScalarGridSpec(
            num_scalar_prefetch=1,                 # seed lands in SMEM
            grid=(num_r_tiles, B),                 # B innermost -> pe tile reused
            in_specs=[
                pl.BlockSpec((1, TR, C), lambda r, b, seed: (b, r, 0)),  # x block
                pl.BlockSpec((TR, C), lambda r, b, seed: (r, 0)),        # pe tile
            ],
            out_specs=pl.BlockSpec((1, TR, C), lambda r, b, seed: (b, r, 0)),
        ),
        compiler_params=pltpu.CompilerParams(
            dimension_semantics=("parallel", "parallel")),   # both axes independent
    )(seed_arr, xv, pev)

    return out.reshape(B, S, D)


if __name__ == "__main__":
    B, S, D = 2, 8, 32
    MAX_LEN = 64          # small max_length for the demo; formula identical to max_length=5000

    key = jax.random.PRNGKey(0)
    x = jax.random.normal(key, (B, S, D), dtype=jnp.float32)
    pe = make_pe(D, MAX_LEN)

    # Eval mode (dropout is identity) -- deterministic, check against reference.
    out_eval = positional_encoding_forward(x, pe, dropout_p=0.1, training=False)
    out_eval = jax.block_until_ready(out_eval)
    ref = x + pe[:, :S, :]
    assert out_eval.shape == (B, S, D)
    assert jnp.allclose(out_eval, ref, atol=1e-6, rtol=1e-6)

    # Training mode (inverted dropout with in-kernel counter-based hash RNG).
    out_train = positional_encoding_forward(x, pe, dropout_p=0.1, training=True, seed=42)
    out_train = jax.block_until_ready(out_train)
    assert out_train.shape == (B, S, D)
    assert bool(jnp.all(jnp.isfinite(out_train)))

    print("KERNEL_OK")
</pallas_src>

<mosaic_0001>
module attributes {stable_mosaic.version = 11 : i64} {
  func.func @_pe_dropout_kernel(%arg0: i32, %arg1: i32, %arg2: memref<1xi32, #tpu.memory_space<smem>>, %arg3: memref<1x2x128xf32, #tpu.memory_space<vmem>>, %arg4: memref<2x128xf32, #tpu.memory_space<vmem>>, %arg5: memref<1x2x128xf32, #tpu.memory_space<vmem>>) attributes {dimension_semantics = [#tpu.dimension_semantics<parallel>, #tpu.dimension_semantics<parallel>], iteration_bounds = array<i64: 1, 2>, scalar_prefetch = 1 : i64, scratch_operands = 0 : i64, tpu.core_type = #tpu.core_type<tc>, window_params = [{transform_indices = @transform_0, window_bounds = array<i64: 1, 2, 128>}, {transform_indices = @transform_1, window_bounds = array<i64: 2, 128>}, {transform_indices = @transform_2, window_bounds = array<i64: 1, 2, 128>}]} {
    %c0 = arith.constant 0 : index
    %c0_0 = arith.constant 0 : index
    %c0_1 = arith.constant 0 : index
    %0 = vector.load %arg3[%c0, %c0_0, %c0_1] : memref<1x2x128xf32, #tpu.memory_space<vmem>>, vector<1x2x128xf32>
    %1 = vector.shape_cast %0 : vector<1x2x128xf32> to vector<2x128xf32>
    %c0_2 = arith.constant 0 : index
    %c0_3 = arith.constant 0 : index
    %2 = vector.load %arg4[%c0_2, %c0_3] : memref<2x128xf32, #tpu.memory_space<vmem>>, vector<2x128xf32>
    %3 = arith.addf %1, %2 : vector<2x128xf32>
    %c0_4 = arith.constant 0 : index
    %c0_5 = arith.constant 0 : index
    %c0_6 = arith.constant 0 : index
    %4 = vector.load %arg5[%c0_4, %c0_5, %c0_6] : memref<1x2x128xf32, #tpu.memory_space<vmem>>, vector<1x2x128xf32>
    %5 = vector.shape_cast %4 : vector<1x2x128xf32> to vector<2x128xf32>
    %6 = vector.shape_cast %3 : vector<2x128xf32> to vector<1x2x128xf32>
    tpu.vector_store %arg5[%c0_4, %c0_5, %c0_6], %6 {strides = array<i32>} : memref<1x2x128xf32, #tpu.memory_space<vmem>>, vector<1x2x128xf32>,
    return
  }
  func.func @transform_0(%arg0: i32, %arg1: i32, %arg2: memref<1xi32, #tpu.memory_space<smem>>) -> (i32, i32, i32) {
    %c0_i32 = arith.constant 0 : i32
    %c0_i32_0 = arith.constant 0 : i32
    return %arg1, %arg0, %c0_i32 : i32, i32, i32
  }
  func.func @transform_1(%arg0: i32, %arg1: i32, %arg2: memref<1xi32, #tpu.memory_space<smem>>) -> (i32, i32) {
    %c0_i32 = arith.constant 0 : i32
    %c0_i32_0 = arith.constant 0 : i32
    return %arg0, %c0_i32 : i32, i32
  }
  func.func @transform_2(%arg0: i32, %arg1: i32, %arg2: memref<1xi32, #tpu.memory_space<smem>>) -> (i32, i32, i32) {
    %c0_i32 = arith.constant 0 : i32
    %c0_i32_0 = arith.constant 0 : i32
    return %arg1, %arg0, %c0_i32 : i32, i32, i32
  }
}

</mosaic_0001>

<bundles_post_ra>
// kernel: tpu_custom_call.1
= control target key start
LH: loop header
LB: loop body
LE: loop exit
PB: predicated region body
PF: predicated region fallthrough
CT: control target
= control target key end

     0   :  { %9 = vsyncpa [#allocation5], 0  ;;  %s696_s0 = inlined_call_operand.<no memory space> [shape: s32[1], index: 0, kind: input, shape index: {}]   ;;  %s697_s1 = inlined_call_operand.hbm [shape: f32[2,2,128], index: 1, kind: input, shape index: {}]   ;;  %s698_s2 = inlined_call_operand.vmem [shape: f32[2,128], index: 2, kind: input, shape index: {}]   ;;  %s699_s3 = inlined_call_operand.hbm [shape: f32[2,2,128], index: 3, kind: output, shape index: {}]  }
   0x1   :  { %11 = vsyncpa [#allocation5 + $0x1], 0 }
   0x2   :  { %12 = vsyncpa [#allocation6], 0 }
   0x3   :  { %14 = vsyncpa [#allocation6 + $0x1], 0  ;;  %s521_s12 = smov 0   ;;  %s523_s13 = smov 0  }
   0x4   :  { %s525_s14 = smov 0   ;;  %s527_s0 = smov 0  }
   0x5   :  { %s529_s15 = smov 0   ;;  %s531_s16 = smov 0  }
   0x6 LB: > { %s309_s17 = sadd.s32 4294967295, %s497_s16   ;;  %s310_s18 = sadd.s32 4294967294, %s497_s16   ;;  %s497_s16 = sphi %s531_s16, %s20_s16   ;;  %s493_s15 = sphi %s529_s15, %s715_s15   ;;  %s489_s0 = sphi %s527_s0, %s714_s0   ;;  %s485_s14 = sphi %s525_s14, %s713_s14   ;;  %s481_s13 = sphi %s523_s13, %s712_s13   ;;  %s477_s12 = sphi %s521_s12, %s711_s12  }
   0x7   : > { %s29_s19 = sadd.s32 1, %s493_s15  ;;  %s41_s20 = sadd.s32 1, %s485_s14 }
   0x8   : > { %p30_p0 = scmp.ge.s32.totalorder %s29_s19, 2  ;;  %p48_p1 = scmp.ne.s32.totalorder %s485_s14, %s481_s13 }
   0x9   : > { %p49_p2 = scmp.eq.s32.totalorder %s497_s16, 0  ;;  %p54_p3 = scmp.ne.s32.totalorder %s481_s13, %s477_s12 }
   0xa   : > { %s717_s19 = smov (%p30_p0, %s29_s19), 0  ;;  %p55_p5 = scmp.eq.s32.totalorder %s309_s17, 0 }
   0xb   : > { %p562_p4 = por %p49_p2, %p48_p1  ;;  %s36_s22 = ssub.s32 %s493_s15, %s717_s19 }
   0xc   : > { %p106_p6 = scmp.eq.s32.totalorder %s309_s17, 1  ;;  %p39_p7 = scmp.eq.s32.totalorder %s36_s22, 0 }
   0xd   : > { %p568_p8 = por %p55_p5, %p54_p3  ;;  %p112_p10 = scmp.eq.s32.totalorder %s310_s18, 1 }
   0xe   : > { %p572_p9 = por %p106_p6, %p48_p1  ;;  %p335_p13 = scmp.lt.s32.totalorder %s497_s16, 2 }
   0xf   : > { %s577_s25 = scalar_select %p39_p7, %s485_s14, %s41_s20  }
  0x10   : > { %s703_s24 = scalar_select %p572_p9, 1, 0 }
  0x11   : > { %p579_p11 = por %p112_p10, %p54_p3  ;;  %s139_s27 = sand.u32 1, %s485_s14  }
  0x12   : > { %s314_s28 = sshll.u32 %s139_s27, 1  ;;  %s315_s29 = sshll.u32 %s493_s15, 5 }
  0x13   : > { %s704_s26 = scalar_select %p579_p11, 1, 0 }
  0x14   : > { %s590_s5 = scalar_lea.hbm %s697_s1, %s315_s29  ;;  %s143_s6 = scalar_lea.vmem [#allocation4], %s314_s28 }
  0x15   : > { %s151_s7 = sshll.u32 %s143_s6, 4  ;;  %p596_p0 = pnand %p335_p13, %p562_p4  ;;  %s592_s7 = int_to_ptr.vmem [resolvable:$true] %s151_s7 }
  0x16   : > { %s140_s9 = scalar_lea.sflag [#allocation5], %s139_s27  ;;  %s385_s10 = scalar_lea.hbm %s590_s5, 32 }
  0x17   : > { %p386_p3 = scmp.ne.s32.totalorder %s590_s5, %s385_s10  ;;  %p387_p5 = pneg %p596_p0 }
  0x18   : > { %s390_s18 = scalar_lea.hbm %s697_s1, 64  ;;  %p391_p4 = scmp.lt.u32.totalorder %s590_s5, %s697_s1 }
  0x19   : > { %p388_p6 = pnand %p387_p5, %p386_p3  ;;  %p392_p10 = scmp.lt.u32.totalorder %s390_s18, %s385_s10 }
  0x1a   : > { %p394_p12 = scmp.lt.u32.totalorder %s385_s10, %s590_s5 }
  0x1b   : > { %p389_p7 = pneg %p388_p6  ;;  %p393_p13 = por %p392_p10, %p391_p4 }
  0x1d   : > { %p395_p1 = por %p394_p12, %p393_p13 }
  0x1f   : > { %p396_p2 = pnand %p395_p1, %p389_p7 }
  0x21   : > { %399 = shalt.err (!%p396_p2)
}
  0x22   : > { %s400_s22 = scalar_lea.vmem %s592_s7, 32  ;;  %s499_s27 = smov [#allocation4]  }
  0x23   : > { %p401_p3 = scmp.ne.s32.totalorder %s592_s7, %s400_s22  ;;  %s405_s28 = sshll.u32 %s499_s27, 4  ;;  %s406_s28 = int_to_ptr.vmem [resolvable:$false] %s405_s28 }
  0x24   : > { %s407_s29 = scalar_lea.vmem %s406_s28, 64  ;;  %p408_p9 = scmp.lt.s32.totalorder %s592_s7, %s406_s28 }
  0x25   : > { %p403_p6 = pnand %p401_p3, %p387_p5  ;;  %p409_p4 = scmp.lt.s32.totalorder %s407_s29, %s400_s22 }
  0x27   : > { %p404_p11 = pneg %p403_p6  ;;  %p410_p10 = por %p409_p4, %p408_p9 }
  0x29   : > { %p411_p12 = pnand %p410_p10, %p404_p11 }
  0x2b   : > { %414 = shalt.err (!%p411_p12)
}
  0x2c   : > { %330 = dma.hbm_to_vmem [thread:$0]  (!%p596_p0), %s590_s5, 32, %s592_s7, %s140_s9  }
  0x2d   : > { %p706_p1 = scmp.lt.s32.totalorder %s497_s16, 3  ;;  %p707_p2 = scmp.ge.s32.totalorder %s497_s16, 1 }
  0x2f   : > { %p157_p5 = pnand %p707_p2, %p706_p1 }
  0x30   : > { %s632_s30 = sand.u32 (!%p157_p5), 1, %s481_s13  }
  0x31   : > { %160 = sbr.rel (%p157_p5) target bundleno = 83 (0x53), region = 28  ;;  %s317_s4 = sshll.u32 (!%p157_p5), %s632_s30, 1 }
  0x32   : > { %s163_s6 = scalar_lea.sflag (!%p157_p5), [#allocation5], %s632_s30  ;;  %s166_s10 = scalar_lea.vmem (!%p157_p5), [#allocation4], %s317_s4 }
  0x38   : > { %468 = dma.done.wait (%p568_p8), %s163_s6, 32  }
  0x39   : > { %470 = vsyncadd (%p568_p8), %s163_s6, 4294967264  ;;  %s190_s5 = scalar_lea.vmem [#allocation7], %s317_s4  ;;  %s320_s8 = sshll.u32 %s489_s0, 5  ;;  %v195_v0 = vld [vmem:[%s166_s10] sm:$0x3] }
  0x3a   : > { %s214_s7 = sshll.u32 %s190_s5, 4  ;;  %v196_v1 = vld [vmem:[%s698_s2] sm:$0x3]  ;;  %s649_s23 = scalar_lea.hbm %s699_s3, %s320_s8  ;;  %s644_s7 = int_to_ptr.vmem [resolvable:$true] %s214_s7 }
  0x3b   : > { %v197_v2 = vadd.f32 %v196_v1, %v195_v0  ;;  %s200_s20 = scalar_lea.sflag [#allocation6], %s632_s30  ;;  %s415_s21 = scalar_lea.vmem %s644_s7, 32 }
  0x3c   : > { %p416_p8 = scmp.ne.s32.totalorder %s644_s7, %s415_s21  ;;  %p708_p9 = scmp.ne.s32.totalorder %s703_s24, 0 }
  0x3d   : > { %198 = vst [vmem:[%s190_s5] sm:$0x3] %v197_v2  ;;  %s500_s0 = smov [#allocation7]  }
  0x3e   : > { %p417_p11 = pnand %p416_p8, %p708_p9  ;;  %s419_s22 = sshll.u32 %s500_s0, 4  ;;  %s420_s22 = int_to_ptr.vmem [resolvable:$false] %s419_s22 }
  0x3f   : > { %s421_s27 = scalar_lea.vmem %s420_s22, 64  ;;  %p422_p7 = scmp.lt.s32.totalorder %s644_s7, %s420_s22 }
  0x40   : > { %p418_p0 = pneg %p417_p11  ;;  %p423_p13 = scmp.lt.s32.totalorder %s421_s27, %s415_s21 }
  0x42   : > { %p424_p3 = por %p423_p13, %p422_p7 }
  0x44   : > { %p425_p6 = pnand %p424_p3, %p418_p0 }
  0x46   : > { %428 = shalt.err (!%p425_p6)
}
  0x47   : > { %s429_s28 = scalar_lea.hbm %s649_s23, 32  ;;  %s433_s4 = scalar_lea.hbm %s699_s3, 64 }
  0x48   : > { %p430_p4 = scmp.ne.s32.totalorder %s649_s23, %s429_s28  ;;  %p434_p1 = scmp.lt.u32.totalorder %s649_s23, %s699_s3 }
  0x49   : > { %p435_p2 = scmp.lt.u32.totalorder %s433_s4, %s429_s28  ;;  %p437_p8 = scmp.lt.u32.totalorder %s429_s28, %s649_s23 }
  0x4a   : > { %p431_p10 = pnand %p430_p4, %p708_p9 }
  0x4b   : > { %p436_p5 = por %p435_p2, %p434_p1 }
  0x4c   : > { %p432_p12 = pneg %p431_p10 }
  0x4d   : > { %p438_p11 = por %p437_p8, %p436_p5 }
  0x4f   : > { %p439_p0 = pnand %p438_p11, %p432_p12 }
  0x51   : > { %442 = shalt.err (!%p439_p0)
}
  0x52   : > { %325 = dma.vmem_to_hbm [thread:$0]  (%p708_p9), %s644_s7, 32, %s649_s23, %s200_s20  }
  0x53 PF: > { %s226_s5 = sand.u32 1, %s477_s12   ;;  %p709_p7 = scmp.ne.s32.totalorder %s704_s26, 0 }
  0x54   : > { %p710_p13 = scmp.ge.s32.totalorder %s497_s16, 2  ;;  %s227_s8 = scalar_lea.sflag [#allocation6], %s226_s5 }
  0x56   : > { %p332_p3 = pnand %p710_p13, %p709_p7 }
  0x58   : > { %472 = dma.done.wait (!%p332_p3), %s227_s8, 32  }
  0x59   : > { %474 = vsyncadd (!%p332_p3), %s227_s8, 4294967264  ;;  %s20_s16 = sadd.s32 1, %s497_s16   ;;  %s711_s12 = smov %s481_s13 }
  0x5a   : > { %p17_p6 = scmp.ge.s32.totalorder %s20_s16, 4   ;;  %s712_s13 = smov %s485_s14 }
  0x5b   : > { %s713_s14 = smov %s577_s25  ;;  %s714_s0 = smov %s493_s15 }
  0x5c   : > { %s715_s15 = smov %s717_s19  ;;  %19 = sbr.rel (!%p17_p6) target bundleno = 6 (0x6), region = 76 }
  0x63   :  { %232 = vsyncpa [#allocation5], 1 }
  0x64   :  { %234 = vsyncpa [#allocation5 + $0x1], 1 }
  0x65   :  { %235 = vsyncpa [#allocation6], 1 }
  0x66   :  { %237 = vsyncpa [#allocation6 + $0x1], 1 }

</bundles_post_ra>
